<compile_context>
chip_gen: v7x
topology: tpu7x:2x2x1
jax: 0.10.0
libtpu: 0.0.40
codegen_flags: <defaults>
</compile_context>

<pallas_src>
import jax
import jax.numpy as jnp
from jax.experimental import pallas as pl
from jax.experimental.pallas import tpu as pltpu

_EPS = 1e-5
_LANE = 128


def _round_up(v, m):
    return (v + m - 1) // m * m


def _pick_tn(n):
    """Batch tile: grid >= 2 when possible, low padding waste, big tiles."""
    n8 = _round_up(max(int(n), 1), 8)
    if n8 <= 1024:
        # Split into (at least) two tiles so both v7x TensorCores get work.
        return _round_up((n8 + 1) // 2, 8)
    # Large batches: pick from {512, 256, 128}, trading padded rows against
    # per-step overhead (~0.35 us/step ~ a few tens of rows of work).
    best_tn, best_cost = 128, None
    for tn in (512, 256, 128):
        n_p = _round_up(n8, tn)
        cost = n_p + 32 * (n_p // tn)
        if best_cost is None or cost < best_cost:
            best_tn, best_cost = tn, cost
    return best_tn


def _maybe_pad(a, pads):
    if all(p[0] == 0 and p[1] == 0 for p in pads):
        return a
    return jnp.pad(a, pads)


def _photo_decoder_kernel(x_ref, w1_ref, b1_ref, w2_ref, b2_ref, o_ref):
    """relu(x @ w1 + b1) -> relu(. @ w2 + b2); BN already folded into w1/b1.

    x_ref: (TN, D_in) native-dtype tile (cast to bf16 here for the MXU);
    w1/w2 bf16 resident; b1/b2 f32 resident; o_ref in the caller's dtype.
    """
    x = x_ref[...].astype(jnp.bfloat16)
    h = jnp.dot(x, w1_ref[...], preferred_element_type=jnp.float32)
    h = jnp.maximum(h + b1_ref[...], 0.0)                       # (TN, H) f32
    out = jnp.dot(h.astype(jnp.bfloat16), w2_ref[...],
                  preferred_element_type=jnp.float32)
    out = jnp.maximum(out + b2_ref[...], 0.0)                   # (TN, D_out)
    o_ref[...] = out.astype(o_ref.dtype)


@jax.jit
def photo_decoder_forward(x, gamma, beta, w1, b1, w2, b2):
    """x: (N, D_in); w1: (D_in, H); w2: (H, D_out) (PyTorch weight.T layout)."""
    n, d_in = x.shape
    hdim = w1.shape[1]
    d_out = w2.shape[1]
    x_bytes = jnp.dtype(x.dtype).itemsize

    xf = x.astype(jnp.float32)

    # --- BatchNorm1d training-mode stats over the FULL batch (hoisted so the
    #     batch axis can be tiled inside the kernel without changing semantics).
    mean = jnp.mean(xf, axis=0, keepdims=True)
    var = jnp.mean(jnp.square(xf - mean), axis=0, keepdims=True)
    inv_std = jax.lax.rsqrt(var + _EPS)
    s = gamma.reshape(1, -1) * inv_std                  # (1, D_in)
    t = beta.reshape(1, -1) - mean * s                  # (1, D_in)

    # --- Fold BN into the first Linear: BN(x)@w1 + b1 == x@(s.T*w1) + (t@w1+b1)
    w1f = (s.reshape(-1, 1) * w1).astype(jnp.float32)   # (D_in, H)
    b1f = (t @ w1 + b1.reshape(1, -1)).astype(jnp.float32)
    w2f = w2.astype(jnp.float32)
    b2f = b2.reshape(1, -1).astype(jnp.float32)

    # --- Pad: feature dims to lane multiples (128), batch to the tile size.
    #     Pads are applied ONLY when needed (no extra HBM pass for aligned x).
    d_in_p = _round_up(d_in, _LANE)
    h_p = _round_up(hdim, _LANE)
    d_out_p = _round_up(d_out, _LANE)
    tn = _pick_tn(n)
    n_p = _round_up(n, tn)

    # x stays in its native dtype -> no wrapper-side materialized bf16 copy.
    x_p = _maybe_pad(x, ((0, n_p - n), (0, d_in_p - d_in)))
    w1_p = _maybe_pad(w1f, ((0, d_in_p - d_in), (0, h_p - hdim))).astype(jnp.bfloat16)
    b1_p = _maybe_pad(b1f, ((0, 0), (0, h_p - hdim)))
    w2_p = _maybe_pad(w2f, ((0, h_p - hdim), (0, d_out_p - d_out))).astype(jnp.bfloat16)
    b2_p = _maybe_pad(b2f, ((0, 0), (0, d_out_p - d_out)))

    grid = (n_p // tn,)

    # --- Resident-operand buffering: single-buffer large weights on v7x-sized
    #     configs (constant index_map -> never re-fetched anyway).
    weight_bytes = (d_in_p * h_p + h_p * d_out_p) * 2            # bf16
    large_weights = weight_bytes > (4 << 20)
    res_kwargs = {"pipeline_mode": pl.Buffered(1)} if large_weights else {}
    w_buf = 1 if large_weights else 2

    # --- VMEM budget, clamped to the physical per-TC VMEM (v7x: 64 MiB).
    try:
        vmem_phys = int(pltpu.get_tpu_info().vmem_capacity_bytes)
    except Exception:
        vmem_phys = 64 << 20                                      # v7x-safe
    vmem_cap = (vmem_phys * 7) // 8                               # headroom
    resident = (weight_bytes + (h_p + d_out_p) * 4) * w_buf
    per_step = 2 * tn * (d_in_p * x_bytes + d_out_p * x_bytes)    # dbl-buffered
    scratch = tn * h_p * 4                                        # f32 hidden
    vmem_limit = int(min(max(resident + per_step + scratch + (4 << 20),
                             min(32 << 20, vmem_cap)), vmem_cap))

    flops = 2 * n_p * (d_in_p * h_p + h_p * d_out_p)
    bytes_accessed = (x_p.size * x_bytes + w1_p.size * 2 + w2_p.size * 2
                      + b1_p.size * 4 + b2_p.size * 4 + n_p * d_out_p * x_bytes)

    out_p = pl.pallas_call(
        _photo_decoder_kernel,
        out_shape=jax.ShapeDtypeStruct((n_p, d_out_p), x.dtype),
        grid=grid,
        in_specs=[
            # Streamed x tile (default double-buffered; bump to pl.Buffered(3)
            # only if profiling shows the DMA exposed on v6e/v7x).
            pl.BlockSpec((tn, d_in_p), lambda i: (i, 0)),
            pl.BlockSpec((d_in_p, h_p), lambda i: (0, 0), **res_kwargs),   # w1
            pl.BlockSpec((1, h_p), lambda i: (0, 0), **res_kwargs),        # b1
            pl.BlockSpec((h_p, d_out_p), lambda i: (0, 0), **res_kwargs),  # w2
            pl.BlockSpec((1, d_out_p), lambda i: (0, 0), **res_kwargs),    # b2
        ],
        out_specs=pl.BlockSpec((tn, d_out_p), lambda i: (i, 0)),
        compiler_params=pltpu.CompilerParams(
            dimension_semantics=("parallel",),
            vmem_limit_bytes=vmem_limit),
        cost_estimate=pl.CostEstimate(
            flops=flops, transcendentals=0, bytes_accessed=bytes_accessed),
    )(x_p, w1_p, b1_p, w2_p, b2_p)

    if n_p == n and d_out_p == d_out:
        return out_p                       # no padding -> no extra slice copy
    return out_p[:n, :d_out]


def _uniform(key, shape, bound):
    return jax.random.uniform(key, shape, jnp.float32, minval=-bound, maxval=bound)


def make_params(key, input_dim, hidden_dim, output_dim):
    """Parameter init mimicking PyTorch defaults; non-trivial gamma/beta."""
    k1, k2, k3, k4, k5, k6 = jax.random.split(key, 6)
    bound1 = 1.0 / (input_dim ** 0.5)
    bound2 = 1.0 / (hidden_dim ** 0.5)
    return dict(
        gamma=jax.random.uniform(k5, (1, input_dim), jnp.float32, 0.5, 1.5),
        beta=jax.random.uniform(k6, (1, input_dim), jnp.float32, -0.5, 0.5),
        # stored as (in, out) == PyTorch weight.T
        w1=_uniform(k1, (input_dim, hidden_dim), bound1),
        b1=_uniform(k2, (1, hidden_dim), bound1),
        w2=_uniform(k3, (hidden_dim, output_dim), bound2),
        b2=_uniform(k4, (1, output_dim), bound2),
    )


def reference_forward(x, p):
    """Pure-JAX f32 reference with PyTorch training-mode BN semantics."""
    xf = x.astype(jnp.float32)
    mean = jnp.mean(xf, axis=0, keepdims=True)
    var = jnp.mean((xf - mean) ** 2, axis=0, keepdims=True)
    xbn = (xf - mean) / jnp.sqrt(var + _EPS) * p["gamma"] + p["beta"]
    h = jnp.maximum(xbn @ p["w1"] + p["b1"], 0.0)
    return jnp.maximum(h @ p["w2"] + p["b2"], 0.0)


if __name__ == "__main__":
    # Small, lane-aligned shapes consistent with the module (defaults 256/512/256).
    batch, input_dim, hidden_dim, output_dim = 64, 128, 256, 128

    key = jax.random.PRNGKey(0)
    kx, kp = jax.random.split(key)
    x = jax.random.normal(kx, (batch, input_dim), jnp.float32)
    params = make_params(kp, input_dim, hidden_dim, output_dim)

    out = photo_decoder_forward(
        x, params["gamma"], params["beta"],
        params["w1"], params["b1"], params["w2"], params["b2"])
    out = jax.block_until_ready(out)

    ref = jax.block_until_ready(reference_forward(x, params))
    assert out.shape == (batch, output_dim)
    max_err = float(jnp.max(jnp.abs(out - ref)))
    # bf16 MXU operands with f32 accumulation -> relaxed tolerance vs f32 ref.
    assert jnp.allclose(out, ref, atol=1e-1, rtol=2e-2), (
        f"mismatch vs reference (max abs err {max_err})")

    print("KERNEL_OK")
</pallas_src>

<mosaic_0001>
module attributes {stable_mosaic.version = 11 : i64} {
  func.func @_photo_decoder_kernel(%arg0: i32, %arg1: memref<32x128xf32, #tpu.memory_space<vmem>>, %arg2: memref<128x256xbf16, #tpu.memory_space<vmem>>, %arg3: memref<1x256xf32, #tpu.memory_space<vmem>>, %arg4: memref<256x128xbf16, #tpu.memory_space<vmem>>, %arg5: memref<1x128xf32, #tpu.memory_space<vmem>>, %arg6: memref<32x128xf32, #tpu.memory_space<vmem>>) attributes {dimension_semantics = [#tpu.dimension_semantics<parallel>], iteration_bounds = array<i64: 2>, scalar_prefetch = 0 : i64, scratch_operands = 0 : i64, tpu.core_type = #tpu.core_type<tc>, window_params = [{transform_indices = @transform_0, window_bounds = array<i64: 32, 128>}, {pipeline_mode = #tpu.pipeline_mode<synchronous>, transform_indices = @transform_1, window_bounds = array<i64: 128, 256>}, {pipeline_mode = #tpu.pipeline_mode<synchronous>, transform_indices = @transform_2, window_bounds = array<i64: 1, 256>}, {pipeline_mode = #tpu.pipeline_mode<synchronous>, transform_indices = @transform_3, window_bounds = array<i64: 256, 128>}, {pipeline_mode = #tpu.pipeline_mode<synchronous>, transform_indices = @transform_4, window_bounds = array<i64: 1, 128>}, {transform_indices = @transform_5, window_bounds = array<i64: 32, 128>}]} {
    %c0 = arith.constant 0 : index
    %c0_0 = arith.constant 0 : index
    %0 = vector.load %arg1[%c0, %c0_0] : memref<32x128xf32, #tpu.memory_space<vmem>>, vector<32x128xf32>
    %1 = arith.truncf %0 : vector<32x128xf32> to vector<32x128xbf16>
    %c0_1 = arith.constant 0 : index
    %c0_2 = arith.constant 0 : index
    %2 = vector.load %arg2[%c0_1, %c0_2] : memref<128x256xbf16, #tpu.memory_space<vmem>>, vector<128x256xbf16>
    %cst = arith.constant dense<0.000000e+00> : vector<32x256xf32>
    %3 = tpu.matmul %1, %2, %cst {dimension_numbers = #tpu.dot_dimension_numbers<[1], [0], [0], [1], [0, 0, 1, 1], [], []>} : vector<32x128xbf16>, vector<128x256xbf16>, vector<32x256xf32> -> vector<32x256xf32>
    %c0_3 = arith.constant 0 : index
    %c0_4 = arith.constant 0 : index
    %4 = vector.load %arg3[%c0_3, %c0_4] : memref<1x256xf32, #tpu.memory_space<vmem>>, vector<1x256xf32>
    %5 = vector.broadcast %4 : vector<1x256xf32> to vector<32x256xf32>
    %6 = arith.addf %3, %5 : vector<32x256xf32>
    %cst_5 = arith.constant 0.000000e+00 : f32
    %7 = vector.broadcast %cst_5 : f32 to vector<32x256xf32>
    %8 = arith.maximumf %6, %7 : vector<32x256xf32>
    %9 = arith.truncf %8 : vector<32x256xf32> to vector<32x256xbf16>
    %c0_6 = arith.constant 0 : index
    %c0_7 = arith.constant 0 : index
    %10 = vector.load %arg4[%c0_6, %c0_7] : memref<256x128xbf16, #tpu.memory_space<vmem>>, vector<256x128xbf16>
    %cst_8 = arith.constant dense<0.000000e+00> : vector<32x128xf32>
    %11 = tpu.matmul %9, %10, %cst_8 {dimension_numbers = #tpu.dot_dimension_numbers<[1], [0], [0], [1], [0, 0, 1, 1], [], []>} : vector<32x256xbf16>, vector<256x128xbf16>, vector<32x128xf32> -> vector<32x128xf32>
    %c0_9 = arith.constant 0 : index
    %c0_10 = arith.constant 0 : index
    %12 = vector.load %arg5[%c0_9, %c0_10] : memref<1x128xf32, #tpu.memory_space<vmem>>, vector<1x128xf32>
    %13 = vector.broadcast %12 : vector<1x128xf32> to vector<32x128xf32>
    %14 = arith.addf %11, %13 : vector<32x128xf32>
    %cst_11 = arith.constant 0.000000e+00 : f32
    %15 = vector.broadcast %cst_11 : f32 to vector<32x128xf32>
    %16 = arith.maximumf %14, %15 : vector<32x128xf32>
    %c0_12 = arith.constant 0 : index
    %c0_13 = arith.constant 0 : index
    %17 = vector.load %arg6[%c0_12, %c0_13] : memref<32x128xf32, #tpu.memory_space<vmem>>, vector<32x128xf32>
    tpu.vector_store %arg6[%c0_12, %c0_13], %16 {strides = array<i32>} : memref<32x128xf32, #tpu.memory_space<vmem>>, vector<32x128xf32>,
    return
  }
  func.func @transform_0(%arg0: i32) -> (i32, i32) {
    %c0_i32 = arith.constant 0 : i32
    %c0_i32_0 = arith.constant 0 : i32
    return %arg0, %c0_i32 : i32, i32
  }
  func.func @transform_1(%arg0: i32) -> (i32, i32) {
    %c0_i32 = arith.constant 0 : i32
    %c0_i32_0 = arith.constant 0 : i32
    %c0_i32_1 = arith.constant 0 : i32
    return %c0_i32, %c0_i32_0 : i32, i32
  }
  func.func @transform_2(%arg0: i32) -> (i32, i32) {
    %c0_i32 = arith.constant 0 : i32
    %c0_i32_0 = arith.constant 0 : i32
    %c0_i32_1 = arith.constant 0 : i32
    return %c0_i32, %c0_i32_0 : i32, i32
  }
  func.func @transform_3(%arg0: i32) -> (i32, i32) {
    %c0_i32 = arith.constant 0 : i32
    %c0_i32_0 = arith.constant 0 : i32
    %c0_i32_1 = arith.constant 0 : i32
    return %c0_i32, %c0_i32_0 : i32, i32
  }
  func.func @transform_4(%arg0: i32) -> (i32, i32) {
    %c0_i32 = arith.constant 0 : i32
    %c0_i32_0 = arith.constant 0 : i32
    %c0_i32_1 = arith.constant 0 : i32
    return %c0_i32, %c0_i32_0 : i32, i32
  }
  func.func @transform_5(%arg0: i32) -> (i32, i32) {
    %c0_i32 = arith.constant 0 : i32
    %c0_i32_0 = arith.constant 0 : i32
    return %arg0, %c0_i32 : i32, i32
  }
}

</mosaic_0001>

<bundles_post_ra>
// kernel: photo_decoder_forward.1
= control target key start
LH: loop header
LB: loop body
LE: loop exit
PB: predicated region body
PF: predicated region fallthrough
CT: control target
= control target key end

     0   :  { %10 = vsyncpa [#allocation3], 0  ;;  %s1136_s0 = inlined_call_operand.vmem [shape: f32[64,128], index: 0, kind: input, shape index: {}]   ;;  %s1137_s1 = inlined_call_operand.vmem [shape: bf16[128,256], index: 1, kind: input, shape index: {}]   ;;  %s1138_s2 = inlined_call_operand.vmem [shape: f32[1,256], index: 2, kind: input, shape index: {}]   ;;  %s1139_s3 = inlined_call_operand.vmem [shape: bf16[256,128], index: 3, kind: input, shape index: {}]   ;;  %s1140_s4 = inlined_call_operand.vmem [shape: f32[1,128], index: 4, kind: input, shape index: {}]   ;;  %s1141_s5 = inlined_call_operand.hbm [shape: f32[64,128], index: 5, kind: output, shape index: {}]  }
   0x1   :  { %12 = vsyncpa [#allocation3 + $0x1], 0  ;;  %s928_s18 = smov 0   ;;  %s930_s19 = smov 0  }
   0x2   :  { %s932_s20 = smov 0   ;;  %s934_s21 = smov 0  }
   0x3 LB: > { %s949_s22 = sadd.s32 4294967295, %s892_s21   ;;  %s674_s23 = sadd.s32 4294967294, %s892_s21   ;;  %s892_s21 = sphi %s934_s21, %s1147_s21   ;;  %s888_s20 = sphi %s932_s20, %s1146_s20   ;;  %s884_s19 = sphi %s930_s19, %s1145_s19   ;;  %s880_s18 = sphi %s928_s18, %s1144_s18  }
   0x4   : > { %s953_s24 = sadd.s32 1, %s892_s21   ;;  %s135_s25 = sadd.s32 1, %s888_s20 }
   0x5   : > { %s132_s26 = ssub.s32 %s892_s21, %s953_s24  ;;  %p145_p0 = scmp.ne.s32.totalorder %s888_s20, %s884_s19 }
   0x6   : > { %p133_p1 = scmp.eq.s32.totalorder %s132_s26, 0  ;;  %p146_p2 = scmp.eq.s32.totalorder %s949_s22, 1 }
   0x7   : > { %p151_p3 = scmp.ne.s32.totalorder %s884_s19, %s880_s18  ;;  %p152_p4 = scmp.eq.s32.totalorder %s674_s23, 1 }
   0x8   : > { %s964_s27 = scalar_select %p133_p1, %s888_s20, %s135_s25  }
   0x9   : > { %p966_p5 = por %p146_p2, %p145_p0  ;;  %p970_p6 = por %p152_p4, %p151_p3 }
   0xa   : > { %p677_p7 = scmp.ge.s32.totalorder %s892_s21, 1  ;;  %p191_p8 = scmp.lt.s32.totalorder %s892_s21, 3 }
   0xc   : > { %p192_p9 = pnand %p677_p7, %p191_p8 }
   0xd   : > { %v790_v0 = vld [vmem:[%s1137_s1 + $0x4] ss:$8 sps:$4 sm:$0xff] (!%p192_p9)   ;;  %v792_v1 = vld [vmem:[%s1137_s1] ss:$8 sps:$4 sm:$0xff] (!%p192_p9)   ;;  %v894_v2 = vmov (!%p192_p9), 0   ;;  %s679_s25 = sshll.u32 (!%p192_p9), %s949_s22, 2  ;;  %v251_v39 = vlaneseq (!%p192_p9) }
   0xe   : > { %195 = sbr.rel (%p192_p9) target bundleno = 512 (0x200), region = 40  ;;  %373 = vmatprep.mubr.bf16.mxu0 (!%p192_p9), %v894_v2  ;;  %341 = vmatprep.subr.bf16.mxu0 (!%p192_p9), %v790_v0  ;;  %v793_v3 = vld [vmem:[%s1137_s1 + $0x14] ss:$8 sps:$4 sm:$0xff] (!%p192_p9)   ;;  %v795_v4 = vld [vmem:[%s1137_s1 + $0x10] ss:$8 sps:$4 sm:$0xff] (!%p192_p9)   ;;  %p220_p10 = scmp.lt.s32.totalorder (!%p192_p9), %s679_s25, 7 }
   0xf   : > { %342 = vmatpush1.bf16.msra.mxu0 (!%p192_p9), %v792_v1  ;;  %v796_v5 = vld [vmem:[%s1137_s1 + $0x24] ss:$8 sps:$4 sm:$0xff] (!%p192_p9)   ;;  %v798_v6 = vld [vmem:[%s1137_s1 + $0x20] ss:$8 sps:$4 sm:$0xff] (!%p192_p9)   ;;  %v799_v7 = vld [vmem:[%s1137_s1 + $0x34] ss:$8 sps:$4 sm:$0xff] (!%p192_p9)  }
  0x10   : > { %343 = vmatprep.subr.bf16.mxu0 (!%p192_p9), %v793_v3  ;;  %v801_v8 = vld [vmem:[%s1137_s1 + $0x30] ss:$8 sps:$4 sm:$0xff] (!%p192_p9)   ;;  %v802_v9 = vld [vmem:[%s1137_s1 + $0x44] ss:$8 sps:$4 sm:$0xff] (!%p192_p9)   ;;  %v804_v11 = vld [vmem:[%s1137_s1 + $0x40] ss:$8 sps:$4 sm:$0xff] (!%p192_p9)  }
  0x11   : > { %v814_v10 = vld [vmem:[%s1139_s3 + $0x40] sm:$0xff] (!%p192_p9)   ;;  %v805_v13 = vld [vmem:[%s1137_s1 + $0x54] ss:$8 sps:$4 sm:$0xff] (!%p192_p9)   ;;  %v816_v14 = vld [vmem:[%s1139_s3 + $0x48] sm:$0xff] (!%p192_p9)   ;;  %v252_v40 = vshrl.u32 (!%p192_p9), %v251_v39, 7  ;;  %s216_s14 = sand.u32 (!%p192_p9), 1, %s884_s19  }
  0x12   : > { %v815_v12 = vld [vmem:[%s1139_s3] sm:$0xff] (!%p192_p9)   ;;  %720 = vmatprep.subr.bf16.mxu1 (!%p192_p9), %v814_v10  ;;  %v817_v15 = vld [vmem:[%s1139_s3 + $0x8] sm:$0xff] (!%p192_p9)   ;;  %v818_v16 = vld [vmem:[%s1139_s3 + $0x50] sm:$0xff] (!%p192_p9)   ;;  %s678_s17 = sshll.u32 (!%p192_p9), %s216_s14, 5  ;;  %s719_s26 = sshll.u32 (!%p192_p9), %s949_s22, 9 }
  0x13   : > { %344 = vmatpush1.bf16.msra.mxu0 (!%p192_p9), %v795_v4  ;;  %721 = vmatpush3.bf16.msra.mxu1 (!%p192_p9), %v815_v12  ;;  %v807_v17 = vld [vmem:[%s1137_s1 + $0x50] ss:$8 sps:$4 sm:$0xff] (!%p192_p9)   ;;  %v808_v18 = vld [vmem:[%s1137_s1 + $0x64] ss:$8 sps:$4 sm:$0xff] (!%p192_p9)   ;;  %v810_v21 = vld [vmem:[%s1137_s1 + $0x60] ss:$8 sps:$4 sm:$0xff] (!%p192_p9)  }
  0x14   : > { %345 = vmatprep.subr.bf16.mxu0 (!%p192_p9), %v796_v5  ;;  %722 = vmatprep.subr.bf16.mxu1 (!%p192_p9), %v816_v14  ;;  %v819_v19 = vld [vmem:[%s1139_s3 + $0x10] sm:$0xff] (!%p192_p9)   ;;  %v820_v20 = vld [vmem:[%s1139_s3 + $0x58] sm:$0xff] (!%p192_p9)   ;;  %v822_v24 = vld [vmem:[%s1139_s3 + $0x60] sm:$0xff] (!%p192_p9)   ;;  %v253_v41 = vsub.s32 (!%p192_p9), 0, %v252_v40  ;;  %v257_v43 = vsub.s32 (!%p192_p9), 1, %v252_v40  ;;  %s1095_s7 = scalar_lea.sflag (!%p192_p9), [#allocation3], %s216_s14 }
  0x15   : > { %s1149_s25 = smov (!%p220_p10, %s679_s25), 7  ;;  %v811_v22 = vld [vmem:[%s1137_s1 + $0x74] ss:$8 sps:$4 sm:$0xff]   ;;  %v813_v25 = vld [vmem:[%s1137_s1 + $0x70] ss:$8 sps:$4 sm:$0xff]   ;;  %v823_v28 = vld [vmem:[%s1139_s3 + $0x20] sm:$0xff]  }
  0x16   : > { %s680_s13 = sshll.u32 %s1149_s25, 3  ;;  %v821_v23 = vld [vmem:[%s1139_s3 + $0x18] sm:$0xff]   ;;  %v824_v29 = vld [vmem:[%s1139_s3 + $0x68] sm:$0xff]   ;;  %v826_v35 = vld [vmem:[%s1139_s3 + $0x70] sm:$0xff]   ;;  %s1091_s25 = scalar_lea.hbm %s1141_s5, %s719_s26 }
  0x17   : > { %346 = vmatpush1.bf16.msra.mxu0 %v798_v6  ;;  %723 = vmatpush3.bf16.msra.mxu1 %v817_v15  ;;  %s223_s10 = scalar_lea.vmem %s1136_s0, %s680_s13  ;;  %v825_v34 = vld [vmem:[%s1139_s3 + $0x28] sm:$0xff]   ;;  %v827_v36 = vld [vmem:[%s1139_s3 + $0x30] sm:$0xff]   ;;  %v828_v37 = vld [vmem:[%s1139_s3 + $0x78] sm:$0xff]   ;;  %s218_s13 = scalar_lea.vmem [#allocation2], %s678_s17 }
  0x18   : > { %347 = vmatprep.subr.bf16.mxu0 %v799_v7  ;;  %724 = vmatprep.subr.bf16.mxu1 %v818_v16  ;;  %v227_v26 = vld [vmem:[%s223_s10] sm:$0xff]  ;;  %v228_v27 = vld [vmem:[%s223_s10 + $0x8] sm:$0xff]  ;;  %v229_v31 = vld [vmem:[%s223_s10 + $0x10] sm:$0xff]  ;;  %s612_s23 = sshll.u32 %s218_s13, 4  ;;  %s895_s22 = smov [#allocation2]   ;;  %s1086_s23 = int_to_ptr.vmem [resolvable:$true] %s612_s23 }
  0x19   : > { %v231_v30 = vpack.c.bf16 %v228_v27, %v227_v26  ;;  %v230_v32 = vld [vmem:[%s223_s10 + $0x18] sm:$0xff]  ;;  %v249_v42 = vld [vmem:[%s1138_s2] sm:$0x3]  ;;  %s830_s8 = scalar_lea.vmem %s1086_s23, 512  ;;  %s834_s9 = sshll.u32 %s895_s22, 4  ;;  %s835_s9 = int_to_ptr.vmem [resolvable:$false] %s834_s9 }
  0x1a   : > { %v232_v33 = vpack.c.bf16 %v230_v32, %v229_v31  ;;  %v829_v38 = vld [vmem:[%s1139_s3 + $0x38] sm:$0xff]   ;;  %v254_v44 = vrot.slane %v249_v42, %v253_v41  ;;  %v258_v45 = vrot.slane %v249_v42, %v257_v43  ;;  %p831_p11 = scmp.ne.s32.totalorder %s1086_s23, %s830_s8  ;;  %s836_s10 = scalar_lea.vmem %s835_s9, 1024 }
  0x1b   : > { %348 = vmatpush1.bf16.msra.mxu0 %v801_v8  ;;  %725 = vmatpush3.bf16.msra.mxu1 %v819_v19  ;;  %p837_p0 = scmp.lt.s32.totalorder %s1086_s23, %s835_s9  ;;  %p838_p1 = scmp.lt.s32.totalorder %s836_s10, %s830_s8 }
  0x1c   : > { %349 = vmatprep.subr.bf16.mxu0 %v802_v9  ;;  %726 = vmatprep.subr.bf16.mxu1 %v820_v20  ;;  %p832_p12 = pnand %p831_p11, %p966_p5 }
  0x1d   : > { %p839_p2 = por %p838_p1, %p837_p0 }
  0x1e   : > { %p833_p13 = pneg %p832_p12 }
  0x1f   : > { %350 = vmatpush1.bf16.msra.mxu0 %v804_v11  ;;  %727 = vmatpush3.bf16.msra.mxu1 %v821_v23  ;;  %v697_v11 = vld [vmem:[%s1140_s4] ss:$0 sm:$0xff] }
  0x20   : > { %351 = vmatprep.subr.bf16.mxu0 %v805_v13  ;;  %728 = vmatprep.subr.bf16.mxu1 %v822_v24  ;;  %p840_p3 = pnand %p839_p2, %p833_p13 }
  0x23   : > { %352 = vmatpush1.bf16.msra.mxu0 %v807_v17  ;;  %729 = vmatpush3.bf16.msra.mxu1 %v823_v28 }
  0x24   : > { %353 = vmatprep.subr.bf16.mxu0 %v808_v18  ;;  %730 = vmatprep.subr.bf16.mxu1 %v824_v29 }
  0x27   : > { %354 = vmatpush1.bf16.msra.mxu0 %v810_v21  ;;  %731 = vmatpush3.bf16.msra.mxu1 %v825_v34 }
  0x28   : > { %355 = vmatprep.subr.bf16.mxu0 %v811_v22  ;;  %732 = vmatprep.subr.bf16.mxu1 %v826_v35 }
  0x2b   : > { %356 = vmatpush1.bf16.msra.mxu0 %v813_v25  ;;  %733 = vmatpush3.bf16.msra.mxu1 %v827_v36 }
  0x2c   : > { %734 = vmatprep.subr.bf16.mxu1 %v828_v37 }
  0x2e   : > { %374 = vmatmul.mubr.bf16.vlgmr.msra.gmra.mrb[0].mxu0 %v231_v30 }
  0x2f   : > { %383 = vmatprep.mubr.bf16.mxu0 %v894_v2  ;;  %735 = vmatpush3.bf16.msra.mxu1 %v829_v38 }
  0x36   : > { %384 = vmatmul.mubr.bf16.gmra.mrb[4].mxu0 %v232_v33 }
 0x101   : > { %v375_v46 = vpop.f32.mrb[0].mxu0 }
 0x102   : > { %v376_v47 = vadd.f32 %v375_v46, %v254_v44  ;;  %v377_v48 = vpop.f32.mrb[1].mxu0 }
 0x103   : > { %v378_v49 = vadd.f32 %v377_v48, %v258_v45  ;;  %v379_v50 = vpop.f32.mrb[2].mxu0 }
 0x104   : > { %v380_v51 = vadd.f32 %v379_v50, %v254_v44  ;;  %v381_v52 = vpop.f32.mrb[3].mxu0  ;;  %v394_v54 = vmax.f32 %v376_v47, 0.0 }
 0x105   : > { %v382_v53 = vadd.f32 %v381_v52, %v258_v45  ;;  %v395_v56 = vmax.f32 %v378_v49, 0.0 }
 0x106   : > { %v396_v55 = vmax.f32 %v380_v51, 0.0 }
 0x107   : > { %v397_v57 = vmax.f32 %v382_v53, 0.0 }
 0x108   : > { %v402_v58 = vpack.c.bf16 %v396_v55, %v394_v54 }
 0x109   : > { %v385_v59 = vpop.f32.mrb[4].mxu0  ;;  %v403_v60 = vpack.c.bf16 %v397_v57, %v395_v56 }
 0x10a   : > { %v386_v61 = vadd.f32 %v385_v59, %v254_v44  ;;  %v387_v62 = vpop.f32.mrb[5].mxu0 }
 0x10b   : > { %v388_v63 = vadd.f32 %v387_v62, %v258_v45  ;;  %v389_v0 = vpop.f32.mrb[6].mxu0  ;;  %573 = vmatprep.mubr.bf16.mxu1 %v403_v60 }
 0x10c   : > { %v390_v1 = vadd.f32 %v389_v0, %v254_v44  ;;  %v391_v2 = vpop.f32.mrb[7].mxu0  ;;  %574 = vmatmul.mubr.bf16.vlgmr.msra.gmra.mrb[0].mxu1 %v402_v58  ;;  %v398_v4 = vmax.f32 %v386_v61, 0.0 }
 0x10d   : > { %v392_v3 = vadd.f32 %v391_v2, %v258_v45  ;;  %v399_v6 = vmax.f32 %v388_v63, 0.0 }
 0x10e   : > { %v400_v5 = vmax.f32 %v390_v1, 0.0 }
 0x10f   : > { %v401_v7 = vmax.f32 %v392_v3, 0.0 }
 0x110   : > { %v404_v8 = vpack.c.bf16 %v400_v5, %v398_v4 }
 0x111   : > { %v405_v9 = vpack.c.bf16 %v401_v7, %v399_v6 }
 0x113   : > { %581 = vmatprep.mubr.bf16.mxu1 %v405_v9 }
 0x114   : > { %582 = vmatmul.mubr.bf16.gmra.mrb[4].mxu1 %v404_v8 }
 0x1df   : > { %v736_v10 = vpop.f32.mrb[0].mxu1 }
 0x1e0   : > { %v737_v12 = vpop.f32.mrb[1].mxu1 }
 0x1e1   : > { %v738_v13 = vadd.f32 %v737_v12, %v736_v10  ;;  %v739_v14 = vpop.f32.mrb[2].mxu1 }
 0x1e2   : > { %v740_v15 = vpop.f32.mrb[3].mxu1 }
 0x1e3   : > { %v576_v16 = vadd.f32 %v738_v13, %v697_v11  ;;  %v741_v17 = vadd.f32 %v740_v15, %v739_v14 }
 0x1e5   : > { %v590_v18 = vmax.f32 %v576_v16, 0.0  ;;  %v579_v19 = vadd.f32 %v741_v17, %v697_v11 }
 0x1e7   : > { %594 = vst [vmem:[%s218_s13] sm:$0xff] %v590_v18  ;;  %v591_v20 = vmax.f32 %v579_v19, 0.0  ;;  %v742_v21 = vpop.f32.mrb[4].mxu1 }
 0x1e8   : > { %v743_v22 = vpop.f32.mrb[5].mxu1 }
 0x1e9   : > { %595 = vst [vmem:[%s218_s13 + $0x8] sm:$0xff] %v591_v20  ;;  %v744_v23 = vadd.f32 %v743_v22, %v742_v21  ;;  %v745_v24 = vpop.f32.mrb[6].mxu1 }
 0x1ea   : > { %v746_v25 = vpop.f32.mrb[7].mxu1 }
 0x1eb   : > { %v584_v26 = vadd.f32 %v744_v23, %v697_v11  ;;  %v747_v27 = vadd.f32 %v746_v25, %v745_v24 }
 0x1ed   : > { %v592_v28 = vmax.f32 %v584_v26, 0.0  ;;  %v587_v29 = vadd.f32 %v747_v27, %v697_v11 }
 0x1ef   : > { %596 = vst [vmem:[%s218_s13 + $0x10] sm:$0xff] %v592_v28  ;;  %v593_v30 = vmax.f32 %v587_v29, 0.0 }
 0x1f1   : > { %597 = vst [vmem:[%s218_s13 + $0x18] sm:$0xff] %v593_v30 }
 0x1f2   : > { %843 = shalt.err (!%p840_p3)
}
 0x1f3   : > { %s844_s11 = scalar_lea.hbm %s1091_s25, 512  ;;  %s848_s15 = scalar_lea.hbm %s1141_s5, 1024 }
 0x1f4   : > { %p845_p4 = scmp.ne.s32.totalorder %s1091_s25, %s844_s11  ;;  %p849_p9 = scmp.lt.u32.totalorder %s1091_s25, %s1141_s5 }
 0x1f5   : > { %p850_p10 = scmp.lt.u32.totalorder %s848_s15, %s844_s11  ;;  %p852_p12 = scmp.lt.u32.totalorder %s844_s11, %s1091_s25 }
 0x1f6   : > { %p846_p7 = pnand %p845_p4, %p966_p5 }
 0x1f7   : > { %p851_p11 = por %p850_p10, %p849_p9 }
 0x1f8   : > { %p847_p8 = pneg %p846_p7 }
 0x1f9   : > { %p853_p13 = por %p852_p12, %p851_p11 }
 0x1fb   : > { %p854_p0 = pnand %p853_p13, %p847_p8 }
 0x1fd   : > { %857 = shalt.err (!%p854_p0)
}
 0x1fe   : > { %s896_s13 = smov 128   ;;  %s897_s26 = smov 8  }
 0x1ff   : > { %748 = dma.vmem_to_hbm [thread:$0]  (%p966_p5), %s1086_s23, 512, %s1091_s25, %s1095_s7, %s896_s13, %s896_s13, %s897_s26  }
 0x200 PF: > { %p754_p1 = scmp.ge.s32.totalorder %s892_s21, 2  ;;  %s627_s30 = sand.u32 1, %s880_s18  }
 0x201   : > { %s628_s6 = scalar_lea.sflag [#allocation3], %s627_s30 }
 0x202   : > { %p751_p2 = pnand %p754_p1, %p970_p6 }
 0x204   : > { %875 = dma.done.wait (!%p751_p2), %s628_s6, 512  }
 0x205   : > { %877 = vsyncadd (!%p751_p2), %s628_s6, 4294966784  ;;  %p15_p3 = scmp.ge.s32.totalorder %s953_s24, 4   ;;  %s1144_s18 = smov %s884_s19 }
 0x206   : > { %s1145_s19 = smov %s888_s20  ;;  %s1146_s20 = smov %s964_s27 }
 0x207   : > { %s1147_s21 = smov %s953_s24  ;;  %17 = sbr.rel (!%p15_p3) target bundleno = 3 (0x3), region = 75 }
 0x20e   :  { %633 = vsyncpa [#allocation3], 1 }
 0x20f   :  { %635 = vsyncpa [#allocation3 + $0x1], 1 }

</bundles_post_ra>
